<compile_context>
chip_gen: v7x
topology: tpu7x:2x2x1
jax: 0.10.0
libtpu: 0.0.40
codegen_flags: <defaults>
</compile_context>

<pallas_src>
import jax
import jax.numpy as jnp
import numpy as np
from jax.experimental import pallas as pl
from jax.experimental.pallas import tpu as pltpu

# cfg constants (standard AdvancedEAST config, defined deterministically here)
EPSILON = 1e-4
LAMBDA_INSIDE_SCORE_LOSS = 4.0
LAMBDA_SIDE_VERTEX_CODE_LOSS = 1.0
LAMBDA_SIDE_VERTEX_COORD_LOSS = 1.0

NUM_CHANNELS = 7   # 1 inside-score + 2 vertex-code + 4 geometry
NUM_ACC = 9        # partial sums produced by the kernel

# Logit x with sigmoid(x) == EPSILON: padding y_pred with this value (and
# y_true with zeros) makes every padded pixel contribute exactly ~0 to all 9
# partial sums, so arbitrary pixel counts are supported without masks.
_PAD_LOGIT = float(np.log(EPSILON) - np.log1p(-EPSILON))


def _cdiv(a, b):
    return -(-a // b)


def _round_up(x, m):
    return _cdiv(x, m) * m


def _loss_partials_kernel(yt_ref, yp_ref, out_ref):
    """yt_ref / yp_ref: (7, TR, 128) f32 blocks. out_ref: (1, 9, 8, 128) f32.

    Rows of the accumulated output (per-lane partial sums, reduced in JAX):
      0: sum(labels)                    1: sum(y_true ch1)
      2: sum(-labels*log(p+eps))        3: sum(-(1-labels)*log(1-p+eps))
      4: S_pos (vertex code, pos part)  5: S_neg (vertex code, neg part)
      6: sum(pos_weights)               7: sum(vertex_weights)
      8: sum(pixel_wise_smooth_l1norm)
    """
    t = pl.program_id(1)

    @pl.when(t == 0)
    def _():
        out_ref[...] = jnp.zeros_like(out_ref)

    eps = EPSILON
    yt = yt_ref[...]                       # (7, TR, 128)
    yp = yp_ref[...]

    # --- sigmoid / log terms for channels 0..2 in one dense slab ---
    # (kept as sigmoid + log(p + eps) to preserve the reference's +eps-inside-
    #  log semantics; the softplus rewrite would change saturation behaviour)
    probs = jax.nn.sigmoid(yp[0:3])        # (3, TR, 128)
    pos_all = -yt[0:3] * jnp.log(probs + eps)
    neg_all = -(1.0 - yt[0:3]) * jnp.log(1.0 - probs + eps)

    labels = yt[0]                         # (TR, 128)
    pos_w = (labels == 1.0).astype(jnp.float32)
    vertex_w = (yt[1] == 1.0).astype(jnp.float32)

    s_pos = (pos_all[1] + pos_all[2]) * pos_w
    s_neg = (neg_all[1] + neg_all[2]) * pos_w

    # --- side vertex coord: smooth-L1 / quad_norm (channels 3..6) ---
    g_true = yt[3:7]
    g_hat = yp[3:7]
    dx = g_true[0] - g_true[2]             # (x0-x1)
    dy = g_true[1] - g_true[3]             # (y0-y1)
    n_q = jnp.sqrt(dx * dx + dy * dy) * 4.0 + eps
    diff = jnp.abs(g_hat - g_true)         # (4, TR, 128)
    sl1 = jnp.where(diff < 1.0, 0.5 * diff * diff, diff - 0.5)
    smooth = (jnp.sum(sl1, axis=0)
              * pl.reciprocal(n_q, approx=True) * vertex_w)

    def fold(x):
        # (TR, 128) -> (8, 128): tile-aligned sublane-group sum (pure VPU adds,
        # no XLU cross-lane reduction in the hot loop).
        return jnp.sum(x.reshape(-1, 8, 128), axis=0)

    parts = jnp.stack(
        [fold(labels), fold(yt[1]), fold(pos_all[0]), fold(neg_all[0]),
         fold(s_pos), fold(s_neg), fold(pos_w), fold(vertex_w), fold(smooth)],
        axis=0)                            # (9, 8, 128)

    out_ref[...] += parts[None]


def _partial_sums(yt_cf, yp_cf, tr, t_steps, nsplit):
    """yt_cf / yp_cf: [7, NB, 128] with NB == nsplit * t_steps * tr."""
    C = yt_cf.shape[0]
    return pl.pallas_call(
        _loss_partials_kernel,
        out_shape=jax.ShapeDtypeStruct((nsplit, NUM_ACC, 8, 128), jnp.float32),
        grid_spec=pltpu.PrefetchScalarGridSpec(
            num_scalar_prefetch=0,
            grid=(nsplit, t_steps),
            in_specs=[
                pl.BlockSpec((C, tr, 128), lambda g, t: (0, g * t_steps + t, 0)),
                pl.BlockSpec((C, tr, 128), lambda g, t: (0, g * t_steps + t, 0)),
            ],
            out_specs=pl.BlockSpec((1, NUM_ACC, 8, 128),
                                   lambda g, t: (g, 0, 0, 0)),
        ),
        compiler_params=pltpu.CompilerParams(
            dimension_semantics=("parallel", "arbitrary")),
    )(yt_cf, yp_cf)


def aeast_loss(y_true, y_pred, *, block_rows=512, nsplit=2):
    """y_true, y_pred: [B, H, W, 7] float32 (NHWC, as in the PyTorch module).

    block_rows=512 -> 7*512*128*4 B ~= 1.75 MB per input block; two inputs,
    double-buffered ~= 7 MB of VMEM, inside the 16 MiB v5e scoped default and
    big enough to sit at the HBM roofline on v6e/v7x.  nsplit=2 gives the two
    v7x TensorCores independent pixel ranges (harmless elsewhere).
    """
    B, H, W, C = y_true.shape
    assert C == NUM_CHANNELS
    n = B * H * W

    # Tiling / padding bookkeeping.
    nb = _cdiv(n, 128)                       # 128-lane pixel rows needed
    rows_per_split = _cdiv(nb, nsplit)
    tr = max(8, min(_round_up(block_rows, 8), _round_up(rows_per_split, 8)))
    t_steps = _cdiv(rows_per_split, tr)
    nb_pad = nsplit * t_steps * tr
    n_pad = nb_pad * 128
    pad = n_pad - n

    # Layout glue: NHWC -> channels-first [7, NB, 128] (+ zero-effect padding).
    # NOTE: for production, produce/keep the prediction & label maps
    # channels-first upstream; this transpose is pure extra HBM traffic for a
    # memory-bound reduction (the kernel itself only needs [7, NB, 128]).
    yt = y_true.reshape(n, C).astype(jnp.float32)
    yp = y_pred.reshape(n, C).astype(jnp.float32)
    if pad:
        yt = jnp.pad(yt, ((0, pad), (0, 0)))
        yp = jnp.pad(yp, ((0, pad), (0, 0)), constant_values=_PAD_LOGIT)
    yt_cf = yt.T.reshape(C, nb_pad, 128)
    yp_cf = yp.T.reshape(C, nb_pad, 128)

    acc = _partial_sums(yt_cf, yp_cf, tr, t_steps, nsplit)  # (nsplit,9,8,128)
    sums = jnp.sum(acc, axis=(0, 2, 3))                     # (9,) tiny reduce

    (sum_labels, sum_v1, a_pos, a_neg, s_pos, s_neg,
     sum_pos_w, sum_vertex_w, smooth_sum) = [sums[i] for i in range(NUM_ACC)]

    nf = jnp.float32(n)
    mean_labels = sum_labels / nf
    beta = 1.0 - mean_labels
    inside_score_loss = (beta * a_pos + (1.0 - beta) * a_neg) / nf
    inside_score_loss = inside_score_loss * LAMBDA_INSIDE_SCORE_LOSS

    mean_v = sum_v1 / nf
    vertex_beta = 1.0 - mean_v / (mean_labels + EPSILON)
    side_vertex_code_loss = (vertex_beta * s_pos
                             + (1.0 - vertex_beta) * s_neg) / (sum_pos_w + EPSILON)
    side_vertex_code_loss = side_vertex_code_loss * LAMBDA_SIDE_VERTEX_CODE_LOSS

    side_vertex_coord_loss = smooth_sum / (sum_vertex_w + EPSILON)
    side_vertex_coord_loss = side_vertex_coord_loss * LAMBDA_SIDE_VERTEX_COORD_LOSS

    return inside_score_loss + side_vertex_code_loss + side_vertex_coord_loss


def aeast_loss_ref(y_true, y_pred):
    """Pure-JAX mirror of the PyTorch forward, for verification."""
    eps = EPSILON
    logits = y_pred[..., :1]
    labels = y_true[..., :1]
    beta = 1.0 - jnp.mean(labels)
    predicts = jax.nn.sigmoid(logits)
    inside = jnp.mean(-1.0 * (beta * labels * jnp.log(predicts + eps)
                              + (1.0 - beta) * (1.0 - labels)
                              * jnp.log(1.0 - predicts + eps)))
    inside = inside * LAMBDA_INSIDE_SCORE_LOSS

    v_logits = y_pred[..., 1:3]
    v_labels = y_true[..., 1:3]
    vertex_beta = 1.0 - jnp.mean(y_true[..., 1:2]) / (jnp.mean(labels) + eps)
    vp = jax.nn.sigmoid(v_logits)
    pos = -1.0 * vertex_beta * v_labels * jnp.log(vp + eps)
    neg = -1.0 * (1.0 - vertex_beta) * (1.0 - v_labels) * jnp.log(1.0 - vp + eps)
    pos_w = (y_true[..., 0] == 1.0).astype(jnp.float32)
    code = jnp.sum(jnp.sum(pos + neg, axis=-1) * pos_w) / (jnp.sum(pos_w) + eps)
    code = code * LAMBDA_SIDE_VERTEX_CODE_LOSS

    g_hat = y_pred[..., 3:]
    g_true = y_true[..., 3:]
    vw = (y_true[..., 1] == 1.0).astype(jnp.float32)
    dxy = g_true.reshape(-1, 2, 2)
    d = dxy[:, 0, :] - dxy[:, 1, :]
    nq = jnp.sqrt(jnp.sum(d * d, axis=-1)) * 4.0 + eps
    nq = nq.reshape(vw.shape)
    diff = jnp.abs(g_hat - g_true)
    sl1 = jnp.sum(jnp.where(diff < 1.0, 0.5 * diff * diff, diff - 0.5),
                  axis=-1) / nq * vw
    coord = jnp.sum(sl1) / (jnp.sum(vw) + eps)
    coord = coord * LAMBDA_SIDE_VERTEX_COORD_LOSS
    return inside + code + coord


if __name__ == "__main__":
    key = jax.random.PRNGKey(0)
    # Two small shapes: one exercises multi-step accumulation, one exercises
    # the zero-effect padding path (pixel count not a multiple of 128).
    for (B, H, W) in [(2, 32, 32), (1, 24, 36)]:
        key, k0, k1, k2, k3, k4 = jax.random.split(key, 6)
        ch0 = jax.random.bernoulli(k0, 0.3, (B, H, W, 1)).astype(jnp.float32)
        ch1 = jax.random.bernoulli(k1, 0.3, (B, H, W, 1)).astype(jnp.float32)
        ch2 = jax.random.uniform(k2, (B, H, W, 1), dtype=jnp.float32)
        geo = jax.random.normal(k3, (B, H, W, 4), dtype=jnp.float32) * 2.0
        y_true = jnp.concatenate([ch0, ch1, ch2, geo], axis=-1)
        y_pred = jax.random.normal(k4, (B, H, W, NUM_CHANNELS), dtype=jnp.float32)

        ref = jax.block_until_ready(aeast_loss_ref(y_true, y_pred))
        for kwargs in ({}, {"block_rows": 8, "nsplit": 1}):
            loss = jax.block_until_ready(aeast_loss(y_true, y_pred, **kwargs))
            np.testing.assert_allclose(np.asarray(loss), np.asarray(ref),
                                       rtol=3e-3, atol=3e-4)
    print("KERNEL_OK")
</pallas_src>

<mosaic_0001>
module attributes {stable_mosaic.version = 11 : i64} {
  func.func @_loss_partials_kernel(%arg0: i32, %arg1: i32, %arg2: memref<7x8x128xf32, #tpu.memory_space<vmem>>, %arg3: memref<7x8x128xf32, #tpu.memory_space<vmem>>, %arg4: memref<1x9x8x128xf32, #tpu.memory_space<vmem>>) attributes {dimension_semantics = [#tpu.dimension_semantics<parallel>, #tpu.dimension_semantics<arbitrary>], iteration_bounds = array<i64: 2, 1>, scalar_prefetch = 0 : i64, scratch_operands = 0 : i64, tpu.core_type = #tpu.core_type<tc>, window_params = [{transform_indices = @transform_0, window_bounds = array<i64: 7, 8, 128>}, {transform_indices = @transform_1, window_bounds = array<i64: 7, 8, 128>}, {transform_indices = @transform_2, window_bounds = array<i64: 1, 9, 8, 128>}]} {
    %c0_i32 = arith.constant 0 : i32
    %0 = arith.cmpi eq, %arg1, %c0_i32 : i32
    %1 = arith.extui %0 : i1 to i32
    %c0_i32_0 = arith.constant 0 : i32
    %2 = arith.cmpi ne, %1, %c0_i32_0 : i32
    scf.if %2 {
      %cst_37 = arith.constant 0.000000e+00 : f32
      %125 = vector.broadcast %cst_37 : f32 to vector<1x9x8x128xf32>
      %c0_38 = arith.constant 0 : index
      %c0_39 = arith.constant 0 : index
      %c0_40 = arith.constant 0 : index
      %c0_41 = arith.constant 0 : index
      %126 = vector.load %arg4[%c0_38, %c0_39, %c0_40, %c0_41] : memref<1x9x8x128xf32, #tpu.memory_space<vmem>>, vector<1x9x8x128xf32>
      tpu.vector_store %arg4[%c0_38, %c0_39, %c0_40, %c0_41], %125 {strides = array<i32>} : memref<1x9x8x128xf32, #tpu.memory_space<vmem>>, vector<1x9x8x128xf32>,
    } else {
    }
    %c0 = arith.constant 0 : index
    %c0_1 = arith.constant 0 : index
    %c0_2 = arith.constant 0 : index
    %3 = vector.load %arg2[%c0, %c0_1, %c0_2] : memref<7x8x128xf32, #tpu.memory_space<vmem>>, vector<7x8x128xf32>
    %c0_3 = arith.constant 0 : index
    %c0_4 = arith.constant 0 : index
    %c0_5 = arith.constant 0 : index
    %4 = vector.load %arg3[%c0_3, %c0_4, %c0_5] : memref<7x8x128xf32, #tpu.memory_space<vmem>>, vector<7x8x128xf32>
    %5 = vector.extract_strided_slice %4 {offsets = [0, 0, 0], sizes = [3, 8, 128], strides = [1, 1, 1]} : vector<7x8x128xf32> to vector<3x8x128xf32>
    %6 = arith.negf %5 : vector<3x8x128xf32>
    %7 = math.exp %6 : vector<3x8x128xf32>
    %cst = arith.constant 1.000000e+00 : f32
    %8 = vector.broadcast %cst : f32 to vector<3x8x128xf32>
    %9 = arith.addf %8, %7 : vector<3x8x128xf32>
    %10 = arith.divf %8, %9 : vector<3x8x128xf32>
    %11 = vector.extract_strided_slice %3 {offsets = [0, 0, 0], sizes = [3, 8, 128], strides = [1, 1, 1]} : vector<7x8x128xf32> to vector<3x8x128xf32>
    %cst_6 = arith.constant 0.000000e+00 : f32
    %12 = vector.broadcast %cst_6 : f32 to vector<3x8x128xf32>
    %13 = arith.subf %12, %11 : vector<3x8x128xf32>
    %cst_7 = arith.constant 9.99999974E-5 : f32
    %14 = vector.broadcast %cst_7 : f32 to vector<3x8x128xf32>
    %15 = arith.addf %10, %14 : vector<3x8x128xf32>
    %16 = math.log %15 : vector<3x8x128xf32>
    %17 = arith.mulf %13, %16 : vector<3x8x128xf32>
    %18 = vector.extract_strided_slice %3 {offsets = [0, 0, 0], sizes = [3, 8, 128], strides = [1, 1, 1]} : vector<7x8x128xf32> to vector<3x8x128xf32>
    %cst_8 = arith.constant 1.000000e+00 : f32
    %19 = vector.broadcast %cst_8 : f32 to vector<3x8x128xf32>
    %20 = arith.subf %19, %18 : vector<3x8x128xf32>
    %cst_9 = arith.constant 0.000000e+00 : f32
    %21 = vector.broadcast %cst_9 : f32 to vector<3x8x128xf32>
    %22 = arith.subf %21, %20 : vector<3x8x128xf32>
    %cst_10 = arith.constant 1.000000e+00 : f32
    %23 = vector.broadcast %cst_10 : f32 to vector<3x8x128xf32>
    %24 = arith.subf %23, %10 : vector<3x8x128xf32>
    %cst_11 = arith.constant 9.99999974E-5 : f32
    %25 = vector.broadcast %cst_11 : f32 to vector<3x8x128xf32>
    %26 = arith.addf %24, %25 : vector<3x8x128xf32>
    %27 = math.log %26 : vector<3x8x128xf32>
    %28 = arith.mulf %22, %27 : vector<3x8x128xf32>
    %29 = vector.extract_strided_slice %3 {offsets = [0, 0, 0], sizes = [1, 8, 128], strides = [1, 1, 1]} : vector<7x8x128xf32> to vector<1x8x128xf32>
    %30 = vector.shape_cast %29 : vector<1x8x128xf32> to vector<8x128xf32>
    %cst_12 = arith.constant 1.000000e+00 : f32
    %31 = vector.broadcast %cst_12 : f32 to vector<8x128xf32>
    %32 = arith.cmpf oeq, %30, %31 : vector<8x128xf32>
    %33 = arith.extui %32 : vector<8x128xi1> to vector<8x128xi32>
    %34 = arith.sitofp %33 : vector<8x128xi32> to vector<8x128xf32>
    %35 = vector.extract_strided_slice %3 {offsets = [1, 0, 0], sizes = [1, 8, 128], strides = [1, 1, 1]} : vector<7x8x128xf32> to vector<1x8x128xf32>
    %36 = vector.shape_cast %35 : vector<1x8x128xf32> to vector<8x128xf32>
    %cst_13 = arith.constant 1.000000e+00 : f32
    %37 = vector.broadcast %cst_13 : f32 to vector<8x128xf32>
    %38 = arith.cmpf oeq, %36, %37 : vector<8x128xf32>
    %39 = arith.extui %38 : vector<8x128xi1> to vector<8x128xi32>
    %40 = arith.sitofp %39 : vector<8x128xi32> to vector<8x128xf32>
    %41 = vector.extract_strided_slice %17 {offsets = [1, 0, 0], sizes = [1, 8, 128], strides = [1, 1, 1]} : vector<3x8x128xf32> to vector<1x8x128xf32>
    %42 = vector.shape_cast %41 : vector<1x8x128xf32> to vector<8x128xf32>
    %43 = vector.extract_strided_slice %17 {offsets = [2, 0, 0], sizes = [1, 8, 128], strides = [1, 1, 1]} : vector<3x8x128xf32> to vector<1x8x128xf32>
    %44 = vector.shape_cast %43 : vector<1x8x128xf32> to vector<8x128xf32>
    %45 = arith.addf %42, %44 : vector<8x128xf32>
    %46 = arith.mulf %45, %34 : vector<8x128xf32>
    %47 = vector.extract_strided_slice %28 {offsets = [1, 0, 0], sizes = [1, 8, 128], strides = [1, 1, 1]} : vector<3x8x128xf32> to vector<1x8x128xf32>
    %48 = vector.shape_cast %47 : vector<1x8x128xf32> to vector<8x128xf32>
    %49 = vector.extract_strided_slice %28 {offsets = [2, 0, 0], sizes = [1, 8, 128], strides = [1, 1, 1]} : vector<3x8x128xf32> to vector<1x8x128xf32>
    %50 = vector.shape_cast %49 : vector<1x8x128xf32> to vector<8x128xf32>
    %51 = arith.addf %48, %50 : vector<8x128xf32>
    %52 = arith.mulf %51, %34 : vector<8x128xf32>
    %53 = vector.extract_strided_slice %3 {offsets = [3, 0, 0], sizes = [4, 8, 128], strides = [1, 1, 1]} : vector<7x8x128xf32> to vector<4x8x128xf32>
    %54 = vector.extract_strided_slice %4 {offsets = [3, 0, 0], sizes = [4, 8, 128], strides = [1, 1, 1]} : vector<7x8x128xf32> to vector<4x8x128xf32>
    %55 = vector.extract_strided_slice %53 {offsets = [0, 0, 0], sizes = [1, 8, 128], strides = [1, 1, 1]} : vector<4x8x128xf32> to vector<1x8x128xf32>
    %56 = vector.shape_cast %55 : vector<1x8x128xf32> to vector<8x128xf32>
    %57 = vector.extract_strided_slice %53 {offsets = [2, 0, 0], sizes = [1, 8, 128], strides = [1, 1, 1]} : vector<4x8x128xf32> to vector<1x8x128xf32>
    %58 = vector.shape_cast %57 : vector<1x8x128xf32> to vector<8x128xf32>
    %59 = arith.subf %56, %58 : vector<8x128xf32>
    %60 = vector.extract_strided_slice %53 {offsets = [1, 0, 0], sizes = [1, 8, 128], strides = [1, 1, 1]} : vector<4x8x128xf32> to vector<1x8x128xf32>
    %61 = vector.shape_cast %60 : vector<1x8x128xf32> to vector<8x128xf32>
    %62 = vector.extract_strided_slice %53 {offsets = [3, 0, 0], sizes = [1, 8, 128], strides = [1, 1, 1]} : vector<4x8x128xf32> to vector<1x8x128xf32>
    %63 = vector.shape_cast %62 : vector<1x8x128xf32> to vector<8x128xf32>
    %64 = arith.subf %61, %63 : vector<8x128xf32>
    %65 = arith.mulf %59, %59 : vector<8x128xf32>
    %66 = arith.mulf %64, %64 : vector<8x128xf32>
    %67 = arith.addf %65, %66 : vector<8x128xf32>
    %68 = math.sqrt %67 : vector<8x128xf32>
    %cst_14 = arith.constant 4.000000e+00 : f32
    %69 = vector.broadcast %cst_14 : f32 to vector<8x128xf32>
    %70 = arith.mulf %68, %69 : vector<8x128xf32>
    %cst_15 = arith.constant 9.99999974E-5 : f32
    %71 = vector.broadcast %cst_15 : f32 to vector<8x128xf32>
    %72 = arith.addf %70, %71 : vector<8x128xf32>
    %73 = arith.subf %54, %53 : vector<4x8x128xf32>
    %74 = math.absf %73 : vector<4x8x128xf32>
    %cst_16 = arith.constant 1.000000e+00 : f32
    %75 = vector.broadcast %cst_16 : f32 to vector<4x8x128xf32>
    %76 = arith.cmpf olt, %74, %75 : vector<4x8x128xf32>
    %cst_17 = arith.constant 5.000000e-01 : f32
    %77 = vector.broadcast %cst_17 : f32 to vector<4x8x128xf32>
    %78 = arith.mulf %77, %74 : vector<4x8x128xf32>
    %79 = arith.mulf %78, %74 : vector<4x8x128xf32>
    %cst_18 = arith.constant 5.000000e-01 : f32
    %80 = vector.broadcast %cst_18 : f32 to vector<4x8x128xf32>
    %81 = arith.subf %74, %80 : vector<4x8x128xf32>
    %82 = arith.select %76, %79, %81 : vector<4x8x128xi1>, vector<4x8x128xf32>
    %cst_19 = arith.constant dense<0.000000e+00> : vector<8x128xf32>
    %83 = vector.multi_reduction <add>, %82, %cst_19 [0] : vector<4x8x128xf32> to vector<8x128xf32>
    %84 = tpu.reciprocal %72 {approx = true} : vector<8x128xf32> -> vector<8x128xf32>
    %85 = arith.mulf %83, %84 : vector<8x128xf32>
    %86 = arith.mulf %85, %40 : vector<8x128xf32>
    %87 = vector.shape_cast %30 : vector<8x128xf32> to vector<1x8x128xf32>
    %cst_20 = arith.constant dense<0.000000e+00> : vector<8x128xf32>
    %88 = vector.multi_reduction <add>, %87, %cst_20 [0] : vector<1x8x128xf32> to vector<8x128xf32>
    %89 = vector.extract_strided_slice %3 {offsets = [1, 0, 0], sizes = [1, 8, 128], strides = [1, 1, 1]} : vector<7x8x128xf32> to vector<1x8x128xf32>
    %90 = vector.shape_cast %89 : vector<1x8x128xf32> to vector<8x128xf32>
    %91 = vector.shape_cast %90 : vector<8x128xf32> to vector<1x8x128xf32>
    %cst_21 = arith.constant dense<0.000000e+00> : vector<8x128xf32>
    %92 = vector.multi_reduction <add>, %91, %cst_21 [0] : vector<1x8x128xf32> to vector<8x128xf32>
    %93 = vector.extract_strided_slice %17 {offsets = [0, 0, 0], sizes = [1, 8, 128], strides = [1, 1, 1]} : vector<3x8x128xf32> to vector<1x8x128xf32>
    %94 = vector.shape_cast %93 : vector<1x8x128xf32> to vector<8x128xf32>
    %95 = vector.shape_cast %94 : vector<8x128xf32> to vector<1x8x128xf32>
    %cst_22 = arith.constant dense<0.000000e+00> : vector<8x128xf32>
    %96 = vector.multi_reduction <add>, %95, %cst_22 [0] : vector<1x8x128xf32> to vector<8x128xf32>
    %97 = vector.extract_strided_slice %28 {offsets = [0, 0, 0], sizes = [1, 8, 128], strides = [1, 1, 1]} : vector<3x8x128xf32> to vector<1x8x128xf32>
    %98 = vector.shape_cast %97 : vector<1x8x128xf32> to vector<8x128xf32>
    %99 = vector.shape_cast %98 : vector<8x128xf32> to vector<1x8x128xf32>
    %cst_23 = arith.constant dense<0.000000e+00> : vector<8x128xf32>
    %100 = vector.multi_reduction <add>, %99, %cst_23 [0] : vector<1x8x128xf32> to vector<8x128xf32>
    %101 = vector.shape_cast %46 : vector<8x128xf32> to vector<1x8x128xf32>
    %cst_24 = arith.constant dense<0.000000e+00> : vector<8x128xf32>
    %102 = vector.multi_reduction <add>, %101, %cst_24 [0] : vector<1x8x128xf32> to vector<8x128xf32>
    %103 = vector.shape_cast %52 : vector<8x128xf32> to vector<1x8x128xf32>
    %cst_25 = arith.constant dense<0.000000e+00> : vector<8x128xf32>
    %104 = vector.multi_reduction <add>, %103, %cst_25 [0] : vector<1x8x128xf32> to vector<8x128xf32>
    %105 = vector.shape_cast %34 : vector<8x128xf32> to vector<1x8x128xf32>
    %cst_26 = arith.constant dense<0.000000e+00> : vector<8x128xf32>
    %106 = vector.multi_reduction <add>, %105, %cst_26 [0] : vector<1x8x128xf32> to vector<8x128xf32>
    %107 = vector.shape_cast %40 : vector<8x128xf32> to vector<1x8x128xf32>
    %cst_27 = arith.constant dense<0.000000e+00> : vector<8x128xf32>
    %108 = vector.multi_reduction <add>, %107, %cst_27 [0] : vector<1x8x128xf32> to vector<8x128xf32>
    %109 = vector.shape_cast %86 : vector<8x128xf32> to vector<1x8x128xf32>
    %cst_28 = arith.constant dense<0.000000e+00> : vector<8x128xf32>
    %110 = vector.multi_reduction <add>, %109, %cst_28 [0] : vector<1x8x128xf32> to vector<8x128xf32>
    %111 = vector.shape_cast %88 : vector<8x128xf32> to vector<1x8x128xf32>
    %112 = vector.shape_cast %92 : vector<8x128xf32> to vector<1x8x128xf32>
    %113 = vector.shape_cast %96 : vector<8x128xf32> to vector<1x8x128xf32>
    %114 = vector.shape_cast %100 : vector<8x128xf32> to vector<1x8x128xf32>
    %115 = vector.shape_cast %102 : vector<8x128xf32> to vector<1x8x128xf32>
    %116 = vector.shape_cast %104 : vector<8x128xf32> to vector<1x8x128xf32>
    %117 = vector.shape_cast %106 : vector<8x128xf32> to vector<1x8x128xf32>
    %118 = vector.shape_cast %108 : vector<8x128xf32> to vector<1x8x128xf32>
    %119 = vector.shape_cast %110 : vector<8x128xf32> to vector<1x8x128xf32>
    %120 = tpu.concatenate %111, %112, %113, %114, %115, %116, %117, %118, %119 in 0 : vector<1x8x128xf32>, vector<1x8x128xf32>, vector<1x8x128xf32>, vector<1x8x128xf32>, vector<1x8x128xf32>, vector<1x8x128xf32>, vector<1x8x128xf32>, vector<1x8x128xf32>, vector<1x8x128xf32> -> vector<9x8x128xf32>
    %c0_29 = arith.constant 0 : index
    %c0_30 = arith.constant 0 : index
    %c0_31 = arith.constant 0 : index
    %c0_32 = arith.constant 0 : index
    %121 = vector.load %arg4[%c0_29, %c0_30, %c0_31, %c0_32] : memref<1x9x8x128xf32, #tpu.memory_space<vmem>>, vector<1x9x8x128xf32>
    %122 = vector.shape_cast %120 : vector<9x8x128xf32> to vector<1x9x8x128xf32>
    %123 = arith.addf %121, %122 : vector<1x9x8x128xf32>
    %c0_33 = arith.constant 0 : index
    %c0_34 = arith.constant 0 : index
    %c0_35 = arith.constant 0 : index
    %c0_36 = arith.constant 0 : index
    %124 = vector.load %arg4[%c0_33, %c0_34, %c0_35, %c0_36] : memref<1x9x8x128xf32, #tpu.memory_space<vmem>>, vector<1x9x8x128xf32>
    tpu.vector_store %arg4[%c0_33, %c0_34, %c0_35, %c0_36], %123 {strides = array<i32>} : memref<1x9x8x128xf32, #tpu.memory_space<vmem>>, vector<1x9x8x128xf32>,
    return
  }
  func.func @transform_0(%arg0: i32, %arg1: i32) -> (i32, i32, i32) {
    %c1_i32 = arith.constant 1 : i32
    %0 = arith.muli %arg0, %c1_i32 : i32
    %1 = arith.addi %0, %arg1 : i32
    %c0_i32 = arith.constant 0 : i32
    %c0_i32_0 = arith.constant 0 : i32
    %c0_i32_1 = arith.constant 0 : i32
    return %c0_i32, %1, %c0_i32_0 : i32, i32, i32
  }
  func.func @transform_1(%arg0: i32, %arg1: i32) -> (i32, i32, i32) {
    %c1_i32 = arith.constant 1 : i32
    %0 = arith.muli %arg0, %c1_i32 : i32
    %1 = arith.addi %0, %arg1 : i32
    %c0_i32 = arith.constant 0 : i32
    %c0_i32_0 = arith.constant 0 : i32
    %c0_i32_1 = arith.constant 0 : i32
    return %c0_i32, %1, %c0_i32_0 : i32, i32, i32
  }
  func.func @transform_2(%arg0: i32, %arg1: i32) -> (i32, i32, i32, i32) {
    %c0_i32 = arith.constant 0 : i32
    %c0_i32_0 = arith.constant 0 : i32
    %c0_i32_1 = arith.constant 0 : i32
    %c0_i32_2 = arith.constant 0 : i32
    return %arg0, %c0_i32, %c0_i32_0, %c0_i32_1 : i32, i32, i32, i32
  }
}

</mosaic_0001>

<bundles_post_ra>
// kernel: tpu_custom_call.1
= control target key start
LH: loop header
LB: loop body
LE: loop exit
PB: predicated region body
PF: predicated region fallthrough
CT: control target
= control target key end

     0   :  { %7 = vsyncpa [#allocation3], 0  ;;  %s1100_s0 = inlined_call_operand.hbm [shape: f32[7,16,128], index: 0, kind: input, shape index: {}]   ;;  %s1101_s1 = inlined_call_operand.hbm [shape: f32[7,16,128], index: 1, kind: input, shape index: {}]   ;;  %s1102_s2 = inlined_call_operand.hbm [shape: f32[2,9,8,128], index: 2, kind: output, shape index: {}]  }
   0x1   :  { %9 = vsyncpa [#allocation3 + $0x1], 0 }
   0x2   :  { %10 = vsyncpa [#allocation6], 0 }
   0x3   :  { %12 = vsyncpa [#allocation6 + $0x1], 0 }
   0x4   :  { %13 = vsyncpa [#allocation4], 0 }
   0x5   :  { %15 = vsyncpa [#allocation4 + $0x1], 0  ;;  %s812_s9 = smov 0   ;;  %s814_s10 = smov 0  }
   0x6   :  { %s816_s11 = smov 0   ;;  %s818_s12 = smov 0  }
   0x7   :  { %s820_s13 = smov 0   ;;  %s822_s14 = smov 0  }
   0x8 LB: > { %s515_s15 = sadd.s32 4294967295, %s786_s14   ;;  %s516_s16 = sadd.s32 4294967294, %s786_s14   ;;  %s786_s14 = sphi %s822_s14, %s21_s14   ;;  %s782_s13 = sphi %s820_s13, %s1119_s13   ;;  %s778_s12 = sphi %s818_s12, %s1118_s12   ;;  %s774_s11 = sphi %s816_s11, %s1117_s11   ;;  %s770_s10 = sphi %s814_s10, %s1116_s10   ;;  %s766_s9 = sphi %s812_s9, %s1115_s9  }
   0x9   : > { %s33_s17 = sadd.s32 1, %s782_s13  ;;  %s42_s18 = sadd.s32 1, %s774_s11 }
   0xa   : > { %p35_p0 = scmp.ge.s32.totalorder %s33_s17, 2  ;;  %p49_p1 = scmp.ne.s32.totalorder %s774_s11, %s770_s10 }
   0xb   : > { %p50_p2 = scmp.eq.s32.totalorder %s786_s14, 0  ;;  %p55_p3 = scmp.ne.s32.totalorder %s770_s10, %s766_s9 }
   0xc   : > { %s1121_s17 = smov (%p35_p0, %s33_s17), 0  ;;  %p56_p5 = scmp.eq.s32.totalorder %s515_s15, 0 }
   0xd   : > { %p853_p4 = por %p50_p2, %p49_p1  ;;  %s39_s20 = ssub.s32 %s782_s13, %s1121_s17 }
   0xe   : > { %p107_p6 = scmp.eq.s32.totalorder %s515_s15, 1  ;;  %p40_p7 = scmp.eq.s32.totalorder %s39_s20, 0 }
   0xf   : > { %p859_p8 = por %p56_p5, %p55_p3  ;;  %p113_p10 = scmp.eq.s32.totalorder %s516_s16, 1 }
  0x10   : > { %p863_p9 = por %p107_p6, %p49_p1  ;;  %p556_p13 = scmp.lt.s32.totalorder %s786_s14, 2 }
  0x11   : > { %s1106_s21 = scalar_select %p859_p8, 1, 0 }
  0x12   : > { %s1107_s22 = scalar_select %p863_p9, 1, 0 }
  0x13   : > { %s868_s23 = scalar_select %p40_p7, %s774_s11, %s42_s18  }
  0x14   : > { %p870_p11 = por %p113_p10, %p55_p3  ;;  %s877_s25 = sand.u32 1, %s774_s11  }
  0x15   : > { %s534_s26 = smul.u32 56, %s877_s25  ;;  %s519_s27 = sshll.u32 %s782_s13, 7 }
  0x16   : > { %s1108_s24 = scalar_select %p870_p11, 1, 0 }
  0x17   : > { %p883_p0 = pnand %p556_p13, %p853_p4  ;;  %s892_s3 = scalar_lea.hbm %s1100_s0, %s519_s27 }
  0x18   : > { %s137_s4 = scalar_lea.vmem [#allocation2], %s534_s26  ;;  %s134_s6 = scalar_lea.sflag [#allocation3], %s877_s25 }
  0x19   : > { %s144_s5 = sshll.u32 %s137_s4, 4  ;;  %s640_s7 = scalar_lea.hbm %s892_s3, 896  ;;  %s896_s5 = int_to_ptr.vmem [resolvable:$true] %s144_s5 }
  0x1a   : > { %p641_p1 = scmp.ne.s32.totalorder %s892_s3, %s640_s7  ;;  %p642_p2 = pneg %p883_p0 }
  0x1b   : > { %s645_s16 = scalar_lea.hbm %s1100_s0, 1792  ;;  %p646_p5 = scmp.lt.u32.totalorder %s892_s3, %s1100_s0 }
  0x1c   : > { %p643_p3 = pnand %p642_p2, %p641_p1  ;;  %p647_p6 = scmp.lt.u32.totalorder %s645_s16, %s640_s7 }
  0x1d   : > { %p649_p10 = scmp.lt.u32.totalorder %s640_s7, %s892_s3 }
  0x1e   : > { %p644_p4 = pneg %p643_p3  ;;  %p648_p7 = por %p647_p6, %p646_p5 }
  0x20   : > { %p650_p13 = por %p649_p10, %p648_p7 }
  0x22   : > { %p651_p12 = pnand %p650_p13, %p644_p4 }
  0x24   : > { %654 = shalt.err (!%p651_p12)
}
  0x25   : > { %s655_s20 = scalar_lea.vmem %s896_s5, 896  ;;  %s788_s29 = smov [#allocation2]  }
  0x26   : > { %p656_p1 = scmp.ne.s32.totalorder %s896_s5, %s655_s20  ;;  %s660_s30 = sshll.u32 %s788_s29, 4  ;;  %s661_s30 = int_to_ptr.vmem [resolvable:$false] %s660_s30 }
  0x27   : > { %s662_s4 = scalar_lea.vmem %s661_s30, 1792  ;;  %p663_p9 = scmp.lt.s32.totalorder %s896_s5, %s661_s30 }
  0x28   : > { %p658_p3 = pnand %p656_p1, %p642_p2  ;;  %p664_p5 = scmp.lt.s32.totalorder %s662_s4, %s655_s20 }
  0x2a   : > { %p659_p11 = pneg %p658_p3  ;;  %p665_p6 = por %p664_p5, %p663_p9 }
  0x2c   : > { %p666_p7 = pnand %p665_p6, %p659_p11 }
  0x2e   : > { %669 = shalt.err (!%p666_p7)
}
  0x2f   : > { %s789_s7 = smov 256   ;;  %s790_s8 = smov 128  }
  0x30   : > { %s791_s15 = smov 8   ;;  %p521_p9 = scmp.ge.s32.totalorder %s786_s14, 1 }
  0x31   : > { %548 = dma.hbm_to_vmem [thread:$0]  (!%p883_p0), %s892_s3, 896, %s896_s5, %s134_s6, %s789_s7, %s790_s8, %s791_s15  }
  0x32   : > { %p173_p11 = scmp.lt.s32.totalorder %s786_s14, 3  ;;  %s940_s20 = scalar_lea.hbm %s1101_s1, %s519_s27 }
  0x33   : > { %s158_s29 = scalar_lea.vmem [#allocation5], %s534_s26  ;;  %s155_s3 = scalar_lea.sflag [#allocation6], %s877_s25 }
  0x34   : > { %p931_p12 = pnand %p521_p9, %p173_p11  ;;  %s165_s30 = sshll.u32 %s158_s29, 4  ;;  %s944_s30 = int_to_ptr.vmem [resolvable:$true] %s165_s30 }
  0x35   : > { %s670_s5 = scalar_lea.hbm %s940_s20, 896  ;;  %s675_s27 = scalar_lea.hbm %s1101_s1, 1792 }
  0x36   : > { %p671_p4 = scmp.ne.s32.totalorder %s940_s20, %s670_s5  ;;  %p676_p1 = scmp.lt.u32.totalorder %s940_s20, %s1101_s1 }
  0x37   : > { %p677_p3 = scmp.lt.u32.totalorder %s675_s27, %s670_s5  ;;  %p679_p6 = scmp.lt.u32.totalorder %s670_s5, %s940_s20 }
  0x38   : > { %p673_p10 = pnand %p671_p4, %p642_p2 }
  0x39   : > { %p678_p5 = por %p677_p3, %p676_p1 }
  0x3a   : > { %p674_p13 = pneg %p673_p10 }
  0x3b   : > { %p680_p7 = por %p679_p6, %p678_p5 }
  0x3d   : > { %p681_p9 = pnand %p680_p7, %p674_p13 }
  0x3f   : > { %684 = shalt.err (!%p681_p9)
}
  0x40   : > { %s685_s26 = scalar_lea.vmem %s944_s30, 896  ;;  %s792_s29 = smov [#allocation5]  }
  0x41   : > { %p686_p11 = scmp.ne.s32.totalorder %s944_s30, %s685_s26  ;;  %s690_s6 = sshll.u32 %s792_s29, 4  ;;  %s691_s6 = int_to_ptr.vmem [resolvable:$false] %s690_s6 }
  0x42   : > { %s692_s4 = scalar_lea.vmem %s691_s6, 1792  ;;  %p693_p8 = scmp.lt.s32.totalorder %s944_s30, %s691_s6 }
  0x43   : > { %p688_p4 = pnand %p686_p11, %p642_p2  ;;  %p694_p1 = scmp.lt.s32.totalorder %s692_s4, %s685_s26 }
  0x45   : > { %p689_p10 = pneg %p688_p4  ;;  %p695_p3 = por %p694_p1, %p693_p8 }
  0x47   : > { %p696_p5 = pnand %p695_p3, %p689_p10 }
  0x49   : > { %699 = shalt.err (!%p696_p5)
}
  0x4a   : > { %551 = dma.hbm_to_vmem [thread:$0]  (!%p883_p0), %s940_s20, 896, %s944_s30, %s155_s3, %s789_s7, %s790_s8, %s791_s15  }
  0x4b   : > { %177 = sbr.rel (%p931_p12) target bundleno = 154 (0x9a), region = 28  ;;  %s978_s5 = sand.u32 (!%p931_p12), 1, %s770_s10  }
  0x4c   : > { %s536_s27 = smul.u32 (!%p931_p12), 56, %s978_s5  ;;  %s180_s18 = scalar_lea.sflag (!%p931_p12), [#allocation3], %s978_s5 }
  0x4d   : > { %p1111_p8 = scmp.ne.s32.totalorder (!%p931_p12), %s1106_s21, 0 }
  0x4e   : > { %s982_s28 = scalar_lea.vmem (!%p931_p12), [#allocation2], %s536_s27 }
  0x52   : > { %753 = dma.done.wait (%p1111_p8), %s180_s18, 896  }
  0x53   : > { %755 = vsyncadd (%p1111_p8), %s180_s18, 4294966400  ;;  %s189_s25 = scalar_lea.sflag [#allocation6], %s978_s5  ;;  %s989_s7 = scalar_lea.vmem [#allocation5], %s536_s27 }
  0x54   : > { %757 = dma.done.wait (%p1111_p8), %s189_s25, 896  }
  0x55   : > { %759 = vsyncadd (%p1111_p8), %s189_s25, 4294966400  ;;  %s537_s8 = smul.u32 72, %s978_s5  ;;  %v997_v0 = vld [vmem:[%s982_s28] sm:$0xff]  ;;  %v1000_v1 = vld [vmem:[%s982_s28 + $0x8] sm:$0xff]  ;;  %v793_v11 = vmov 0.0   ;;  %s396_s19 = scalar_lea.sflag [#allocation4], %s978_s5 }
  0x56   : > { %v240_v2 = vld [vmem:[%s989_s7] sm:$0xff]  ;;  %v241_v4 = vld [vmem:[%s989_s7 + $0x8] sm:$0xff]  ;;  %v242_v5 = vld [vmem:[%s989_s7 + $0x10] sm:$0xff]  ;;  %vm301_vm0 = vcmp.eq.f32.partialorder %v997_v0, 1.0  ;;  %vm304_vm1 = vcmp.eq.f32.partialorder %v1000_v1, 1.0  ;;  %s538_s15 = smul.u32 1152, %s778_s12 }
  0x57   : > { %v522_v3 = vmul.f32 -1.442695, %v240_v2  ;;  %v523_v6 = vmul.f32 -1.442695, %v241_v4  ;;  %v524_v7 = vmul.f32 -1.442695, %v242_v5 }
  0x58   : > { %s1005_s21 = scalar_lea.vmem [#allocation7], %s537_s8  ;;  %v236_v8 = vld [vmem:[%s982_s28 + $0x18] sm:$0xff]  ;;  %v237_v9 = vld [vmem:[%s982_s28 + $0x20] sm:$0xff]  ;;  %v238_v10 = vld [vmem:[%s982_s28 + $0x28] sm:$0xff]  ;;  %v1015_v12 = vsel %vm301_vm0, 1.0, %v793_v11  ;;  %v1019_v14 = vsel %vm304_vm1, 1.0, %v793_v11  ;;  %s1048_s3 = scalar_lea.hbm %s1102_s2, %s538_s15 }
  0x59   : > { %386 = vst [vmem:[%s1005_s21] sm:$0xff] %v997_v0  ;;  %387 = vst [vmem:[%s1005_s21 + $0x8] sm:$0xff] %v1000_v1  ;;  %612 = vpow2.f32 %v522_v3  ;;  %v239_v13 = vld [vmem:[%s982_s28 + $0x30] sm:$0xff]  ;;  %v311_v15 = vsub.f32 %v236_v8, %v238_v10  ;;  %v243_v20 = vld [vmem:[%s989_s7 + $0x18] sm:$0xff]  ;;  %v280_v11 = vsub.f32 1.0, %v997_v0  ;;  %s409_s16 = sshll.u32 %s1005_s21, 4  ;;  %p1112_p2 = scmp.ne.s32.totalorder %s1107_s22, 0  ;;  %s1050_s16 = int_to_ptr.vmem [resolvable:$true] %s409_s16 }
  0x5a   : > { %614 = vpow2.f32 %v523_v6  ;;  %v312_v16 = vsub.f32 %v237_v9, %v239_v13  ;;  %392 = vst [vmem:[%s1005_s21 + $0x30] sm:$0xff] %v1015_v12  ;;  %393 = vst [vmem:[%s1005_s21 + $0x38] sm:$0xff] %v1019_v14  ;;  %v244_v21 = vld [vmem:[%s989_s7 + $0x20] sm:$0xff]  ;;  %v245_v23 = vld [vmem:[%s989_s7 + $0x28] sm:$0xff]  ;;  %v325_v26 = vsub.f32 %v243_v20, %v236_v8  ;;  %s700_s26 = scalar_lea.vmem %s1050_s16, 1152  ;;  %s794_s12 = smov [#allocation7]  }
  0x5b   : > { %616 = vpow2.f32 %v524_v7  ;;  %v313_v17 = vmul.f32 %v311_v15, %v311_v15  ;;  %v326_v29 = vsub.f32 %v244_v21, %v237_v9  ;;  %v327_v31 = vsub.f32 %v245_v23, %v238_v10  ;;  %v246_v32 = vld [vmem:[%s989_s7 + $0x30] sm:$0xff]  ;;  %p701_p0 = scmp.ne.s32.totalorder %s1050_s16, %s700_s26  ;;  %s704_s29 = sshll.u32 %s794_s12, 4  ;;  %s705_s29 = int_to_ptr.vmem [resolvable:$false] %s704_s29 }
  0x5c   : > { %v314_v18 = vmul.f32 %v312_v16, %v312_v16  ;;  %v329_v33 = vand.u32 2147483647, %v325_v26  ;;  %v328_v35 = vsub.f32 %v246_v32, %v239_v13  ;;  %v235_v13 = vld [vmem:[%s982_s28 + $0x10] sm:$0xff]  ;;  %v281_v15 = vsub.f32 1.0, %v1000_v1  ;;  %s706_s6 = scalar_lea.vmem %s705_s29, 2304  ;;  %p707_p6 = scmp.lt.s32.totalorder %s1050_s16, %s705_s29 }
  0x5d   : > { %v330_v34 = vand.u32 2147483647, %v326_v29  ;;  %v331_v36 = vand.u32 2147483647, %v327_v31  ;;  %v265_v16 = vsub.f32 0.0, %v997_v0  ;;  %v282_v20 = vsub.f32 1.0, %v235_v13  ;;  %p702_p12 = pnand %p701_p0, %p1112_p2  ;;  %p708_p7 = scmp.lt.s32.totalorder %s706_s6, %s700_s26 }
  0x5e   : > { %v315_v19 = vadd.f32 %v314_v18, %v313_v17  ;;  %v337_v39 = vmul.f32 0.5, %v329_v33  ;;  %v332_v42 = vand.u32 2147483647, %v328_v35  ;;  %vm333_vm4 = vcmp.lt.f32.partialorder %v329_v33, 1.0 }
  0x5f   : > { %v338_v41 = vmul.f32 0.5, %v330_v34  ;;  %v339_v43 = vmul.f32 0.5, %v331_v36  ;;  %vm334_vm5 = vcmp.lt.f32.partialorder %v330_v34, 1.0  ;;  %v527_v48 = vadd.f32 -0.5, %v329_v33  ;;  %p703_p13 = pneg %p702_p12  ;;  %p709_p9 = por %p708_p7, %p707_p6 }
  0x60   : > { %618 = vrsqrt.f32 %v315_v19  ;;  %vm318_vm2 = vcmp.eq.f32.partialorder %v315_v19, inf  ;;  %v321_v38 = vand.u32 2147483648, %v315_v19  ;;  %vm320_vm3 = vcmp.eq.f32.partialorder %v315_v19, 0.0 }
  0x61   : > { %v341_v47 = vmul.f32 %v337_v39, %v329_v33  ;;  %v528_v49 = vadd.f32 -0.5, %v330_v34  ;;  %v342_v54 = vmul.f32 %v338_v41, %v330_v34  ;;  %v340_v58 = vmul.f32 0.5, %v332_v42  ;;  %p710_p11 = pnand %p709_p9, %p703_p13 }
  0x62   : > { %v343_v59 = vmul.f32 %v339_v43, %v331_v36  ;;  %v529_v2 = vadd.f32 -0.5, %v331_v36  ;;  %vm335_vm6 = vcmp.lt.f32.partialorder %v331_v36, 1.0  ;;  %v530_v9 = vadd.f32 -0.5, %v332_v42 }
  0x63   : > { %v613_v22 = vpop.eup %612  ;;  %v349_v3 = vsel %vm333_vm4, %v341_v47, %v527_v48  ;;  %v350_v6 = vsel %vm334_vm5, %v342_v54, %v528_v49  ;;  %v344_v8 = vmul.f32 %v340_v58, %v332_v42  ;;  %vm336_vm7 = vcmp.lt.f32.partialorder %v332_v42, 1.0 }
  0x64   : > { %v615_v24 = vpop.eup %614  ;;  %v256_v25 = vadd.f32 1.0, %v613_v22  ;;  %v353_v7 = vadd.f32 %v350_v6, %v349_v3  ;;  %v351_v10 = vsel %vm335_vm6, %v343_v59, %v529_v2  ;;  %v267_v26 = vsub.f32 0.0, %v235_v13 }
  0x65   : > { %v617_v27 = vpop.eup %616  ;;  %v257_v28 = vadd.f32 1.0, %v615_v24  ;;  %v352_v21 = vsel %vm336_vm7, %v344_v8, %v530_v9  ;;  %v283_v24 = vsub.f32 0.0, %v280_v11  ;;  %v284_v31 = vsub.f32 0.0, %v281_v15 }
  0x66   : > { %620 = vrcp.f32 %v256_v25  ;;  %v258_v30 = vadd.f32 1.0, %v617_v27  ;;  %v354_v17 = vadd.f32 %v353_v7, %v351_v10  ;;  %v285_v35 = vsub.f32 0.0, %v282_v20 }
  0x67   : > { %622 = vrcp.f32 %v257_v28 }
  0x68   : > { %624 = vrcp.f32 %v258_v30  ;;  %v355_v32 = vadd.f32 %v354_v17, %v352_v21 }
  0x6a   : > { %v619_v37 = vpop.eup %618 }
  0x6b   : > { %v317_v40 = vmul.f32 %v619_v37, %v315_v19 }
  0x6d   : > { %v319_v44 = vsel %vm318_vm2, %v315_v19, %v317_v40  ;;  %v266_v19 = vsub.f32 0.0, %v1000_v1 }
  0x6e   : > { %v322_v46 = vsel %vm320_vm3, %v321_v38, %v319_v44 }
  0x6f   : > { %v323_v53 = vmul.f32 4.0, %v322_v46 }
  0x70   : > { %v621_v45 = vpop.eup %620 }
  0x71   : > { %v623_v50 = vpop.eup %622  ;;  %v268_v51 = vadd.f32 0.0001, %v621_v45  ;;  %v286_v52 = vsub.f32 1.0, %v621_v45  ;;  %v324_v5 = vadd.f32 0.0001, %v323_v53 }
  0x72   : > { %v625_v55 = vpop.eup %624  ;;  %v269_v56 = vadd.f32 0.0001, %v623_v50  ;;  %v287_v57 = vsub.f32 1.0, %v623_v50 }
  0x73   : > { %626 = vlog2.f32 %v268_v51  ;;  %v289_v60 = vadd.f32 0.0001, %v286_v52  ;;  %v270_v61 = vadd.f32 0.0001, %v625_v55  ;;  %v288_v62 = vsub.f32 1.0, %v625_v55 }
  0x74   : > { %628 = vlog2.f32 %v269_v56  ;;  %v290_v63 = vadd.f32 0.0001, %v287_v57 }
  0x75   : > { %630 = vlog2.f32 %v289_v60  ;;  %v291_v4 = vadd.f32 0.0001, %v288_v62 }
  0x76   : > { %632 = vlog2.f32 %v270_v61 }
  0x77   : > { %634 = vlog2.f32 %v290_v63 }
  0x78   : > { %636 = vlog2.f32 %v291_v4 }
  0x79   : > { %638 = vrcp.f32 %v324_v5 }
  0x7d   : > { %v627_v18 = vpop.eup %626 }
  0x7e   : > { %v629_v22 = vpop.eup %628  ;;  %v272_v23 = vmul.f32 0.6931472, %v627_v18 }
  0x7f   : > { %v631_v25 = vpop.eup %630  ;;  %v274_v27 = vmul.f32 0.6931472, %v629_v22 }
  0x80   : > { %v633_v28 = vpop.eup %632  ;;  %v277_v29 = vmul.f32 %v272_v23, %v265_v16  ;;  %v293_v30 = vmul.f32 0.6931472, %v631_v25 }
  0x81   : > { %v635_v0 = vpop.eup %634  ;;  %v276_v33 = vmul.f32 0.6931472, %v633_v28  ;;  %v278_v34 = vmul.f32 %v274_v27, %v266_v19 }
  0x82   : > { %v637_v1 = vpop.eup %636  ;;  %v298_v36 = vmul.f32 %v293_v30, %v283_v24  ;;  %v295_v37 = vmul.f32 0.6931472, %v635_v0  ;;  %388 = vst [vmem:[%s1005_s21 + $0x10] sm:$0xff] %v277_v29 }
  0x83   : > { %v639_v38 = vpop.eup %638  ;;  %v279_v39 = vmul.f32 %v276_v33, %v267_v26  ;;  %v297_v40 = vmul.f32 0.6931472, %v637_v1 }
  0x84   : > { %v299_v41 = vmul.f32 %v295_v37, %v284_v31  ;;  %v357_v42 = vmul.f32 %v639_v38, %v355_v32  ;;  %389 = vst [vmem:[%s1005_s21 + $0x18] sm:$0xff] %v298_v36 }
  0x85   : > { %v307_v43 = vadd.f32 %v279_v39, %v278_v34  ;;  %v300_v44 = vmul.f32 %v297_v40, %v285_v35 }
  0x86   : > { %v358_v45 = vmul.f32 %v1019_v14, %v357_v42 }
  0x87   : > { %v308_v46 = vmul.f32 %v1015_v12, %v307_v43  ;;  %v309_v47 = vadd.f32 %v300_v44, %v299_v41 }
  0x88   : > { %394 = vst [vmem:[%s1005_s21 + $0x40] sm:$0xff] %v358_v45 }
  0x89   : > { %v310_v48 = vmul.f32 %v1015_v12, %v309_v47  ;;  %390 = vst [vmem:[%s1005_s21 + $0x20] sm:$0xff] %v308_v46 }
  0x8b   : > { %391 = vst [vmem:[%s1005_s21 + $0x28] sm:$0xff] %v310_v48 }
  0x8c   : > { %713 = shalt.err (!%p710_p11)
}
  0x8d   : > { %s714_s4 = scalar_lea.hbm %s1048_s3, 1152  ;;  %s718_s28 = scalar_lea.hbm %s1102_s2, 2304 }
  0x8e   : > { %p715_p4 = scmp.ne.s32.totalorder %s1048_s3, %s714_s4  ;;  %p719_p3 = scmp.lt.u32.totalorder %s1048_s3, %s1102_s2 }
  0x8f   : > { %p720_p5 = scmp.lt.u32.totalorder %s718_s28, %s714_s4  ;;  %p722_p0 = scmp.lt.u32.totalorder %s714_s4, %s1048_s3 }
  0x90   : > { %p716_p10 = pnand %p715_p4, %p1112_p2 }
  0x91   : > { %p721_p8 = por %p720_p5, %p719_p3 }
  0x92   : > { %p717_p1 = pneg %p716_p10 }
  0x93   : > { %p723_p12 = por %p722_p0, %p721_p8 }
  0x95   : > { %p724_p13 = pnand %p723_p12, %p717_p1 }
  0x97   : > { %727 = shalt.err (!%p724_p13)
}
  0x98   : > { %s795_s8 = smov 128   ;;  %s796_s21 = smov 8  }
  0x99   : > { %543 = dma.vmem_to_hbm [thread:$0]  (%p1112_p2), %s1050_s16, 1152, %s1048_s3, %s396_s19, %s795_s8, %s795_s8, %s796_s21  }
  0x9a PF: > { %s424_s15 = sand.u32 1, %s766_s9   ;;  %p1113_p6 = scmp.ne.s32.totalorder %s1108_s24, 0 }
  0x9b   : > { %p1114_p7 = scmp.ge.s32.totalorder %s786_s14, 2  ;;  %s425_s20 = scalar_lea.sflag [#allocation4], %s424_s15 }
  0x9d   : > { %p553_p9 = pnand %p1114_p7, %p1113_p6 }
  0x9f   : > { %761 = dma.done.wait (!%p553_p9), %s425_s20, 1152  }
  0xa0   : > { %763 = vsyncadd (!%p553_p9), %s425_s20, 4294966144  ;;  %s21_s14 = sadd.s32 1, %s786_s14   ;;  %s1115_s9 = smov %s770_s10 }
  0xa1   : > { %p18_p11 = scmp.ge.s32.totalorder %s21_s14, 4   ;;  %s1116_s10 = smov %s774_s11 }
  0xa2   : > { %s1117_s11 = smov %s868_s23  ;;  %s1118_s12 = smov %s782_s13 }
  0xa3   : > { %s1119_s13 = smov %s1121_s17  ;;  %20 = sbr.rel (!%p18_p11) target bundleno = 8 (0x8), region = 90 }
  0xaa   :  { %430 = vsyncpa [#allocation3], 1 }
  0xab   :  { %432 = vsyncpa [#allocation3 + $0x1], 1 }
  0xac   :  { %433 = vsyncpa [#allocation6], 1 }
  0xad   :  { %435 = vsyncpa [#allocation6 + $0x1], 1 }
  0xae   :  { %436 = vsyncpa [#allocation4], 1 }
  0xaf   :  { %438 = vsyncpa [#allocation4 + $0x1], 1 }

</bundles_post_ra>
